<compile_context>
chip_gen: v6e
topology: v6e:2x2x1
jax: 0.10.0
libtpu: 0.0.40
codegen_flags: <defaults>
</compile_context>

<pallas_src>
import jax
import jax.numpy as jnp
from jax.experimental import pallas as pl
from jax.experimental.pallas import tpu as pltpu


# ------------------------------ helpers -------------------------------------
def _round_up(x, m):
    return (x + m - 1) // m * m


def _pad_axis(a, axis, target):
    pad = target - a.shape[axis]
    if pad == 0:
        return a
    widths = [(0, 0)] * a.ndim
    widths[axis] = (0, pad)
    return jnp.pad(a, widths)


def _choose_tile(dim_padded, pref, grain):
    """Largest multiple of `grain` that divides `dim_padded` and is <= pref."""
    t = max(grain, min(pref, dim_padded) // grain * grain)
    while dim_padded % t != 0:
        t -= grain
    return t


# ------------------------------ kernels -------------------------------------
def _dense_relu_kernel(x_ref, w_ref, b_ref, o_ref):
    """relu(x @ w + b): single K tile (or no grid) -> no accumulator scratch."""
    acc = jnp.dot(x_ref[...], w_ref[...], preferred_element_type=jnp.float32)
    acc = acc + b_ref[...].astype(jnp.float32)
    o_ref[...] = jnp.maximum(acc, 0.0).astype(o_ref.dtype)


def _dense_relu_acc_kernel(x_ref, w_ref, b_ref, o_ref, acc_ref):
    """relu(x @ w + b) with K-tiled f32 accumulation."""
    k = pl.program_id(2)
    part = jnp.dot(x_ref[...], w_ref[...], preferred_element_type=jnp.float32)

    @pl.when(k == 0)
    def _init():
        acc_ref[...] = part            # direct write: no zero-fill + add pass

    @pl.when(k > 0)
    def _accum():
        acc_ref[...] += part

    @pl.when(k == pl.num_programs(2) - 1)
    def _epilogue():
        y = acc_ref[...] + b_ref[...].astype(jnp.float32)
        o_ref[...] = jnp.maximum(y, 0.0).astype(o_ref.dtype)


# --------------------------- dense+ReLU module -------------------------------
class PallasDense:
    """y = relu(x @ W + b) with padded (optionally bf16) weights persisted."""

    def __init__(self, w, b, *, compute_dtype=None, tm=256, tn=256, tk=256,
                 weight_buffers=2, single_block_max_bytes=2 << 20):
        w = jnp.asarray(w)
        D_in, D_out = w.shape
        self._d_in, self._d_out = D_in, D_out
        self._tm_pref, self._tn_pref, self._tk_pref = tm, tn, tk
        self._weight_buffers = weight_buffers
        self._single_block_max_bytes = single_block_max_bytes
        self._compute_dtype = compute_dtype

        Kp = _round_up(D_in, 128)
        Np = _round_up(D_out, 128)
        self._Kp, self._Np = Kp, Np

        # Robust to (D_out,) or (1, D_out) bias.
        b = jnp.reshape(jnp.asarray(b), (1, D_out))
        if compute_dtype is not None:
            w = w.astype(compute_dtype)
        # Padding + cast happen ONCE here, never in the per-call forward path.
        self._wp = _pad_axis(_pad_axis(w, 0, Kp), 1, Np)
        self._bp = _pad_axis(b, 1, Np)

        # VMEM ceiling with ~15% headroom (v7x: 64 MiB, v5e/v6e: 128 MiB).
        try:
            cap = int(pltpu.get_tpu_info().vmem_capacity_bytes)
        except Exception:
            cap = 64 << 20
        self._vmem_ceiling = int(cap * 0.85)

    def __call__(self, x):
        assert x.ndim == 2 and x.shape[1] == self._d_in, x.shape
        out_dtype = x.dtype
        B = x.shape[0]
        Kp, Np = self._Kp, self._Np
        Mp = _round_up(B, 8)

        if self._compute_dtype is not None:
            x = x.astype(self._compute_dtype)
        xp = _pad_axis(_pad_axis(x, 0, Mp), 1, Kp)

        itm = jnp.dtype(xp.dtype).itemsize
        oitm = jnp.dtype(out_dtype).itemsize
        total_bytes = ((Mp * Kp + Kp * Np) * itm
                       + Np * jnp.dtype(self._bp.dtype).itemsize
                       + Mp * Np * oitm)

        if total_bytes <= self._single_block_max_bytes:
            out = self._single_block(xp, Mp, Kp, Np, out_dtype)
        else:
            out = self._tiled(xp, Mp, Kp, Np, out_dtype, itm, oitm)

        if Mp != B or Np != self._d_out:
            out = out[:B, :self._d_out]
        return out

    # Tiny problems: whole x, W, b in VMEM, one dot + bias + relu, no grid.
    def _single_block(self, xp, Mp, Kp, Np, out_dtype):
        return pl.pallas_call(
            _dense_relu_kernel,
            out_shape=jax.ShapeDtypeStruct((Mp, Np), out_dtype),
            in_specs=[
                pl.BlockSpec((Mp, Kp), lambda: (0, 0)),
                pl.BlockSpec((Kp, Np), lambda: (0, 0)),
                pl.BlockSpec((1, Np), lambda: (0, 0)),
            ],
            out_specs=pl.BlockSpec((Mp, Np), lambda: (0, 0)),
        )(xp, self._wp, self._bp)

    def _tiled(self, xp, Mp, Kp, Np, out_dtype, itm, oitm):
        tm = _choose_tile(Mp, self._tm_pref, 8)
        tn = _choose_tile(Np, self._tn_pref, 128)
        tk = _choose_tile(Kp, self._tk_pref, 128)

        # Keep >= 2 parallel (M, N) tiles so both v7x TensorCores get work.
        if (Mp // tm) * (Np // tn) < 2 and Np >= 256:
            tn = _choose_tile(Np, Np // 2, 128)

        nm, nn, nk = Mp // tm, Np // tn, Kp // tk

        # Optional deeper buffering on W for long K loops with exposed DMA.
        w_spec_kwargs = {}
        if self._weight_buffers > 2 and nk >= self._weight_buffers:
            w_spec_kwargs = dict(pipeline_mode=pl.Buffered(self._weight_buffers))

        wbuf = max(2, self._weight_buffers)
        vmem_bytes = (2 * tm * tk * itm + wbuf * tk * tn * itm
                      + 2 * tn * jnp.dtype(self._bp.dtype).itemsize
                      + 2 * tm * tn * oitm
                      + tm * tn * 4)
        vmem_limit = int(min(max(2 * vmem_bytes, 4 << 20), self._vmem_ceiling))

        if nk == 1:
            # Single K step: no accumulator scratch, bias+relu fused with dot.
            return pl.pallas_call(
                _dense_relu_kernel,
                out_shape=jax.ShapeDtypeStruct((Mp, Np), out_dtype),
                grid=(nm, nn),
                in_specs=[
                    pl.BlockSpec((tm, tk), lambda i, j: (i, 0)),
                    pl.BlockSpec((tk, tn), lambda i, j: (0, j)),
                    pl.BlockSpec((1, tn), lambda i, j: (0, j)),
                ],
                out_specs=pl.BlockSpec((tm, tn), lambda i, j: (i, j)),
                compiler_params=pltpu.CompilerParams(
                    dimension_semantics=("parallel", "parallel"),
                    vmem_limit_bytes=vmem_limit,
                ),
            )(xp, self._wp, self._bp)

        return pl.pallas_call(
            _dense_relu_acc_kernel,
            out_shape=jax.ShapeDtypeStruct((Mp, Np), out_dtype),
            grid=(nm, nn, nk),
            in_specs=[
                pl.BlockSpec((tm, tk), lambda i, j, k: (i, k)),
                pl.BlockSpec((tk, tn), lambda i, j, k: (k, j), **w_spec_kwargs),
                pl.BlockSpec((1, tn), lambda i, j, k: (0, j)),
            ],
            out_specs=pl.BlockSpec((tm, tn), lambda i, j, k: (i, j)),
            scratch_shapes=[pltpu.VMEM((tm, tn), jnp.float32)],
            compiler_params=pltpu.CompilerParams(
                dimension_semantics=("parallel", "parallel", "arbitrary"),
                vmem_limit_bytes=vmem_limit,
            ),
        )(xp, self._wp, self._bp)


# --------------------------- NetworkWrapper port -----------------------------
class NetworkWrapper:
    """JAX port of alf NetworkWrapper: wraps a callable as a Network.

    forward(x, state=()) -> (module(x), state)   when state_spec == ()
    forward(x, state)    -> module(x, state)     otherwise
    """

    def __init__(self, module, input_tensor_spec=None, state_spec=(),
                 name="NetworkWrapper"):
        assert callable(module), "module is not Callable: %s" % type(module)
        self._module = module
        self._input_tensor_spec = input_tensor_spec
        self._state_spec = state_spec
        self._name = name

    @property
    def name(self):
        return self._name

    @property
    def state_spec(self):
        return self._state_spec

    @property
    def input_tensor_spec(self):
        return self._input_tensor_spec

    def forward(self, x, state=()):
        if state == ():
            return (self._module(x), state)
        else:
            return self._module(x, state)

    __call__ = forward

    # TODO(synk): make_parallel / NaiveParallelNetwork is a parameter-replication
    # construct (n independent weight copies), not a kernel op; not implemented.


# --------------------------------- main --------------------------------------
if __name__ == "__main__":
    key = jax.random.PRNGKey(0)
    kx, kw, kb, kx2, kw2, kb2, kx3, kw3, kb3 = jax.random.split(key, 9)

    # 1) Aligned small problem -> single-block fast path, f32 weights.
    B, D_in, D_out = 8, 256, 256
    w = jax.random.normal(kw, (D_in, D_out), jnp.float32) / jnp.sqrt(D_in)
    b = jax.random.normal(kb, (1, D_out), jnp.float32) * 0.01
    x = jax.random.normal(kx, (B, D_in), jnp.float32)

    net = NetworkWrapper(PallasDense(w, b),
                         input_tensor_spec=((D_in,), jnp.float32))
    out, new_state = net(x, ())
    out = jax.block_until_ready(out)
    ref = jnp.maximum(x @ w + b, 0.0)
    assert out.shape == (B, D_out)
    assert new_state == ()
    assert jnp.allclose(out, ref, atol=2e-2, rtol=2e-2)

    # 2) Persisted bf16 weights (cast once at construction), f32 accumulate.
    net_bf16 = NetworkWrapper(PallasDense(w, b, compute_dtype=jnp.bfloat16),
                              input_tensor_spec=((D_in,), jnp.float32))
    out_bf, _ = net_bf16(x, ())
    out_bf = jax.block_until_ready(out_bf)
    assert out_bf.shape == (B, D_out)
    assert jnp.allclose(out_bf, ref, atol=0.2, rtol=0.1)

    # 3) Ragged shapes + (D_out,) bias: padded only to the (8, 128) grain.
    x2 = jax.random.normal(kx2, (3, 200), jnp.float32)
    w2 = jax.random.normal(kw2, (200, 96), jnp.float32) / jnp.sqrt(200.0)
    b2 = jax.random.normal(kb2, (96,), jnp.float32) * 0.01
    out2 = jax.block_until_ready(PallasDense(w2, b2)(x2))
    ref2 = jnp.maximum(x2 @ w2 + b2[None, :], 0.0)
    assert out2.shape == (3, 96)
    assert jnp.allclose(out2, ref2, atol=2e-2, rtol=2e-2)

    # 4) Force the K-tiled accumulator path (grid (1, 2, 4)), exercising the
    #    direct-write k==0 init and the >=2-parallel-tiles split.
    B3, D_in3, D_out3 = 16, 512, 256
    w3 = jax.random.normal(kw3, (D_in3, D_out3), jnp.float32) / jnp.sqrt(D_in3)
    b3 = jax.random.normal(kb3, (1, D_out3), jnp.float32) * 0.01
    x3 = jax.random.normal(kx3, (B3, D_in3), jnp.float32)
    dense3 = PallasDense(w3, b3, tm=128, tn=256, tk=128,
                         single_block_max_bytes=0)   # force the tiled path
    out3 = jax.block_until_ready(dense3(x3))
    ref3 = jnp.maximum(x3 @ w3 + b3, 0.0)
    assert out3.shape == (B3, D_out3)
    assert jnp.allclose(out3, ref3, atol=2e-2, rtol=2e-2)

    print("KERNEL_OK")
</pallas_src>

<mosaic_0001>
module attributes {stable_mosaic.version = 11 : i64} {
  func.func @_dense_relu_kernel(%arg0: memref<8x256xf32, #tpu.memory_space<vmem>>, %arg1: memref<256x256xf32, #tpu.memory_space<vmem>>, %arg2: memref<1x256xf32, #tpu.memory_space<vmem>>, %arg3: memref<8x256xf32, #tpu.memory_space<vmem>>) attributes {dimension_semantics = [], scalar_prefetch = 0 : i64, scratch_operands = 0 : i64, tpu.core_type = #tpu.core_type<tc>} {
    %c0 = arith.constant 0 : index
    %c0_0 = arith.constant 0 : index
    %0 = vector.load %arg0[%c0, %c0_0] : memref<8x256xf32, #tpu.memory_space<vmem>>, vector<8x256xf32>
    %c0_1 = arith.constant 0 : index
    %c0_2 = arith.constant 0 : index
    %1 = vector.load %arg1[%c0_1, %c0_2] : memref<256x256xf32, #tpu.memory_space<vmem>>, vector<256x256xf32>
    %cst = arith.constant dense<0.000000e+00> : vector<8x256xf32>
    %2 = tpu.matmul %0, %1, %cst {dimension_numbers = #tpu.dot_dimension_numbers<[1], [0], [0], [1], [0, 0, 1, 1], [], []>} : vector<8x256xf32>, vector<256x256xf32>, vector<8x256xf32> -> vector<8x256xf32>
    %c0_3 = arith.constant 0 : index
    %c0_4 = arith.constant 0 : index
    %3 = vector.load %arg2[%c0_3, %c0_4] : memref<1x256xf32, #tpu.memory_space<vmem>>, vector<1x256xf32>
    %4 = vector.broadcast %3 : vector<1x256xf32> to vector<8x256xf32>
    %5 = arith.addf %2, %4 : vector<8x256xf32>
    %cst_5 = arith.constant 0.000000e+00 : f32
    %6 = vector.broadcast %cst_5 : f32 to vector<8x256xf32>
    %7 = arith.maximumf %5, %6 : vector<8x256xf32>
    %c0_6 = arith.constant 0 : index
    %c0_7 = arith.constant 0 : index
    %8 = vector.load %arg3[%c0_6, %c0_7] : memref<8x256xf32, #tpu.memory_space<vmem>>, vector<8x256xf32>
    tpu.vector_store %arg3[%c0_6, %c0_7], %7 {strides = array<i32>} : memref<8x256xf32, #tpu.memory_space<vmem>>, vector<8x256xf32>,
    return
  }
}

</mosaic_0001>

<bundles_post_ra>
// kernel: tpu_custom_call.1
= control target key start
LH: loop header
LB: loop body
LE: loop exit
PB: predicated region body
PF: predicated region fallthrough
CT: control target
= control target key end

     0   :  { %8 = vsyncpa [#allocation3], 0  ;;  %s318_s0 = inlined_call_operand.hbm [shape: f32[8,256], index: 0, kind: input, shape index: {}]   ;;  %s319_s1 = inlined_call_operand.hbm [shape: f32[256,256], index: 1, kind: input, shape index: {}]   ;;  %s320_s2 = inlined_call_operand.vmem [shape: f32[1,256], index: 2, kind: input, shape index: {}]   ;;  %s321_s3 = inlined_call_operand.hbm [shape: f32[8,256], index: 3, kind: output, shape index: {}]  }
   0x1   :  { %9 = vsyncpa [#allocation6], 0 }
   0x2   :  { %10 = vsyncpa [#allocation4], 0  ;;  %s281_s12 = smov [#allocation2]   ;;  %s282_s14 = smov [#allocation5]  }
   0x3   :  { %s17_s13 = sshll.u32 %s281_s12, 4  ;;  %s26_s15 = sshll.u32 %s282_s14, 4  ;;  %s18_s13 = int_to_ptr.vmem [resolvable:$true] %s17_s13  ;;  %s27_s15 = int_to_ptr.vmem [resolvable:$true] %s26_s15 }
   0x4   :  { %s223_s16 = scalar_lea.vmem %s18_s13, 256  ;;  %p228_p1 = scmp.lt.s32.totalorder %s18_s13, %s18_s13 }
   0x5   :  { %p224_p0 = scmp.ne.s32.totalorder %s18_s13, %s223_s16  ;;  %p229_p2 = scmp.lt.s32.totalorder %s223_s16, %s223_s16 }
   0x7   :  { %p230_p3 = por %p229_p2, %p228_p1 }
   0x9   :  { %p231_p4 = pnand %p230_p3, %p224_p0 }
   0xb   :  { %234 = shalt.err (!%p231_p4)
}
   0xc   :  { %20 = dma.hbm_to_vmem [thread:$0]  %s318_s0, 256, %s18_s13, [#allocation3]  }
   0xd   :  { %s243_s19 = scalar_lea.vmem %s27_s15, 8192  ;;  %p248_p6 = scmp.lt.s32.totalorder %s27_s15, %s27_s15 }
   0xe   :  { %p244_p5 = scmp.ne.s32.totalorder %s27_s15, %s243_s19  ;;  %p249_p7 = scmp.lt.s32.totalorder %s243_s19, %s243_s19 }
  0x10   :  { %p250_p8 = por %p249_p7, %p248_p6 }
  0x12   :  { %p251_p9 = pnand %p250_p8, %p244_p5 }
  0x14   :  { %254 = shalt.err (!%p251_p9)
}
  0x15   :  { %s283_s20 = smov 256   ;;  %s284_s21 = smov 16  }
  0x16   :  { %32 = dma.hbm_to_vmem [thread:$0]  %s319_s1, 8192, %s27_s15, [#allocation6], %s283_s20, %s283_s20, %s284_s21  }
  0x17   :  { %275 = dma.done.wait [#allocation3], 256  }
  0x18   :  { %276 = vsyncadd [#allocation3], 4294967040 }
  0x19   :  { %277 = dma.done.wait [#allocation6], 8192  }
  0x1a   :  { %278 = vsyncadd [#allocation6], 4294959104  ;;  %v74_v0 = vld [vmem:[#allocation5 + $0xf8] sm:$0xff]  ;;  %v73_v1 = vld [vmem:[#allocation5 + $0xf0] sm:$0xff]  ;;  %s285_s24 = smov [#allocation7]  }
  0x1b   :  { %v72_v2 = vld [vmem:[#allocation5 + $0xe8] sm:$0xff]  ;;  %119 = vmatprep.subr.mxu0 %v74_v0  ;;  %v71_v3 = vld [vmem:[#allocation5 + $0xe0] sm:$0xff]  ;;  %v70_v4 = vld [vmem:[#allocation5 + $0xd8] sm:$0xff]  ;;  %s200_s25 = sshll.u32 %s285_s24, 4  ;;  %s201_s25 = int_to_ptr.vmem [resolvable:$true] %s200_s25 }
  0x1c   :  { %120 = vmatpush1.msra.mxu0 %v73_v1  ;;  %v69_v5 = vld [vmem:[#allocation5 + $0xd0] sm:$0xff]  ;;  %v68_v6 = vld [vmem:[#allocation5 + $0xc8] sm:$0xff]  ;;  %v67_v7 = vld [vmem:[#allocation5 + $0xc0] sm:$0xff]  ;;  %s255_s26 = scalar_lea.vmem %s201_s25, 256  ;;  %p260_p11 = scmp.lt.s32.totalorder %s201_s25, %s201_s25 }
  0x1d   :  { %121 = vmatprep.subr.mxu0 %v72_v2  ;;  %v66_v8 = vld [vmem:[#allocation5 + $0xb8] sm:$0xff]  ;;  %v65_v9 = vld [vmem:[#allocation5 + $0xb0] sm:$0xff]  ;;  %v64_v10 = vld [vmem:[#allocation5 + $0xa8] sm:$0xff]  ;;  %v109_v2 = vlaneseq  ;;  %p256_p10 = scmp.ne.s32.totalorder %s201_s25, %s255_s26  ;;  %p261_p12 = scmp.lt.s32.totalorder %s255_s26, %s255_s26 }
  0x1e   :  { %122 = vmatpush1.msra.mxu0 %v71_v3  ;;  %v63_v11 = vld [vmem:[#allocation5 + $0xa0] sm:$0xff]  ;;  %v62_v12 = vld [vmem:[#allocation5 + $0x98] sm:$0xff]  ;;  %v61_v13 = vld [vmem:[#allocation5 + $0x90] sm:$0xff] }
  0x1f   :  { %123 = vmatprep.subr.mxu0 %v70_v4  ;;  %v60_v14 = vld [vmem:[#allocation5 + $0x88] sm:$0xff]  ;;  %v59_v15 = vld [vmem:[#allocation5 + $0x80] sm:$0xff]  ;;  %v58_v16 = vld [vmem:[#allocation5 + $0x78] sm:$0xff]  ;;  %v110_v3 = vshrl.u32 %v109_v2, 7  ;;  %p262_p13 = por %p261_p12, %p260_p11 }
  0x20   :  { %124 = vmatpush1.msra.mxu0 %v69_v5  ;;  %v57_v17 = vld [vmem:[#allocation5 + $0x70] sm:$0xff]  ;;  %v56_v18 = vld [vmem:[#allocation5 + $0x68] sm:$0xff]  ;;  %v55_v19 = vld [vmem:[#allocation5 + $0x60] sm:$0xff] }
  0x21   :  { %125 = vmatprep.subr.mxu0 %v68_v6  ;;  %v54_v20 = vld [vmem:[#allocation5 + $0x58] sm:$0xff]  ;;  %v53_v21 = vld [vmem:[#allocation5 + $0x50] sm:$0xff]  ;;  %v52_v22 = vld [vmem:[#allocation5 + $0x48] sm:$0xff]  ;;  %v111_v4 = vsub.s32 0, %v110_v3  ;;  %v115_v6 = vsub.s32 1, %v110_v3  ;;  %p263_p0 = pnand %p262_p13, %p256_p10 }
  0x22   :  { %126 = vmatpush1.msra.mxu0 %v67_v7  ;;  %v51_v23 = vld [vmem:[#allocation5 + $0x40] sm:$0xff]  ;;  %v42_v24 = vld [vmem:[#allocation2 + $0x8] sm:$0xff]  ;;  %v49_v26 = vld [vmem:[#allocation5 + $0x30] sm:$0xff] }
  0x23   :  { %127 = vmatprep.subr.mxu0 %v66_v8  ;;  %v50_v25 = vld [vmem:[#allocation5 + $0x38] sm:$0xff]  ;;  %183 = vmatprep.mubr.f32.mxu0 %v42_v24  ;;  %v48_v27 = vld [vmem:[#allocation5 + $0x28] sm:$0xff]  ;;  %v47_v28 = vld [vmem:[#allocation5 + $0x20] sm:$0xff] }
  0x24   :  { %128 = vmatpush1.msra.mxu0 %v65_v9  ;;  %v46_v29 = vld [vmem:[#allocation5 + $0x18] sm:$0xff]  ;;  %v45_v30 = vld [vmem:[#allocation5 + $0x10] sm:$0xff]  ;;  %v44_v31 = vld [vmem:[#allocation5 + $0x8] sm:$0xff] }
  0x25   :  { %129 = vmatprep.subr.mxu0 %v64_v10  ;;  %v43_v32 = vld [vmem:[#allocation5] sm:$0xff]  ;;  %v106_v33 = vld [vmem:[#allocation5 + $0x1f8] sm:$0xff]  ;;  %v105_v34 = vld [vmem:[#allocation5 + $0x1f0] sm:$0xff] }
  0x26   :  { %130 = vmatpush1.msra.mxu0 %v63_v11  ;;  %v104_v35 = vld [vmem:[#allocation5 + $0x1e8] sm:$0xff]  ;;  %v103_v36 = vld [vmem:[#allocation5 + $0x1e0] sm:$0xff]  ;;  %v102_v37 = vld [vmem:[#allocation5 + $0x1d8] sm:$0xff] }
  0x27   :  { %131 = vmatprep.subr.mxu0 %v62_v12  ;;  %v101_v38 = vld [vmem:[#allocation5 + $0x1d0] sm:$0xff]  ;;  %v100_v39 = vld [vmem:[#allocation5 + $0x1c8] sm:$0xff]  ;;  %v99_v40 = vld [vmem:[#allocation5 + $0x1c0] sm:$0xff] }
  0x28   :  { %132 = vmatpush1.msra.mxu0 %v61_v13  ;;  %v98_v41 = vld [vmem:[#allocation5 + $0x1b8] sm:$0xff]  ;;  %v97_v42 = vld [vmem:[#allocation5 + $0x1b0] sm:$0xff]  ;;  %v96_v43 = vld [vmem:[#allocation5 + $0x1a8] sm:$0xff] }
  0x29   :  { %133 = vmatprep.subr.mxu0 %v60_v14  ;;  %v95_v44 = vld [vmem:[#allocation5 + $0x1a0] sm:$0xff]  ;;  %v94_v45 = vld [vmem:[#allocation5 + $0x198] sm:$0xff]  ;;  %v93_v46 = vld [vmem:[#allocation5 + $0x190] sm:$0xff] }
  0x2a   :  { %134 = vmatpush1.msra.mxu0 %v59_v15  ;;  %v92_v47 = vld [vmem:[#allocation5 + $0x188] sm:$0xff]  ;;  %v91_v48 = vld [vmem:[#allocation5 + $0x180] sm:$0xff]  ;;  %v90_v49 = vld [vmem:[#allocation5 + $0x178] sm:$0xff] }
  0x2b   :  { %135 = vmatprep.subr.mxu0 %v58_v16  ;;  %v89_v50 = vld [vmem:[#allocation5 + $0x170] sm:$0xff]  ;;  %v88_v51 = vld [vmem:[#allocation5 + $0x168] sm:$0xff]  ;;  %v87_v52 = vld [vmem:[#allocation5 + $0x160] sm:$0xff] }
  0x2c   :  { %136 = vmatpush1.msra.mxu0 %v57_v17  ;;  %v86_v53 = vld [vmem:[#allocation5 + $0x158] sm:$0xff]  ;;  %v85_v54 = vld [vmem:[#allocation5 + $0x150] sm:$0xff]  ;;  %v84_v55 = vld [vmem:[#allocation5 + $0x148] sm:$0xff] }
  0x2d   :  { %137 = vmatprep.subr.mxu0 %v56_v18  ;;  %v83_v56 = vld [vmem:[#allocation5 + $0x140] sm:$0xff]  ;;  %v82_v57 = vld [vmem:[#allocation5 + $0x138] sm:$0xff]  ;;  %v81_v58 = vld [vmem:[#allocation5 + $0x130] sm:$0xff] }
  0x2e   :  { %138 = vmatpush1.msra.mxu0 %v55_v19  ;;  %v80_v59 = vld [vmem:[#allocation5 + $0x128] sm:$0xff]  ;;  %v79_v60 = vld [vmem:[#allocation5 + $0x120] sm:$0xff]  ;;  %v78_v61 = vld [vmem:[#allocation5 + $0x118] sm:$0xff] }
  0x2f   :  { %139 = vmatprep.subr.mxu0 %v54_v20  ;;  %v77_v62 = vld [vmem:[#allocation5 + $0x110] sm:$0xff]  ;;  %v76_v63 = vld [vmem:[#allocation5 + $0x108] sm:$0xff]  ;;  %v75_v0 = vld [vmem:[#allocation5 + $0x100] sm:$0xff] }
  0x30   :  { %140 = vmatpush1.msra.mxu0 %v53_v21  ;;  %v41_v1 = vld [vmem:[#allocation2] sm:$0xff] }
  0x31   :  { %141 = vmatprep.subr.mxu0 %v52_v22  ;;  %v107_v5 = vld [vmem:[%s320_s2] sm:$0x3] }
  0x32   :  { %142 = vmatpush1.msra.mxu0 %v51_v23  ;;  %v112_v7 = vrot.slane %v107_v5, %v111_v4  ;;  %v116_v8 = vrot.slane %v107_v5, %v115_v6 }
  0x33   :  { %143 = vmatprep.subr.mxu0 %v50_v25 }
  0x34   :  { %144 = vmatpush1.msra.mxu0 %v49_v26 }
  0x35   :  { %145 = vmatprep.subr.mxu0 %v48_v27 }
  0x36   :  { %146 = vmatpush1.msra.mxu0 %v47_v28 }
  0x37   :  { %147 = vmatprep.subr.mxu0 %v46_v29 }
  0x38   :  { %148 = vmatpush1.msra.mxu0 %v45_v30 }
  0x39   :  { %149 = vmatprep.subr.mxu0 %v44_v31 }
  0x3a   :  { %150 = vmatpush1.msra.mxu0 %v43_v32 }
  0x3b   :  { %151 = vmatprep.subr.mxu0 %v106_v33 }
  0x3c   :  { %152 = vmatpush2.msra.mxu0 %v105_v34 }
  0x3d   :  { %153 = vmatprep.subr.mxu0 %v104_v35 }
  0x3e   :  { %154 = vmatpush2.msra.mxu0 %v103_v36 }
  0x3f   :  { %155 = vmatprep.subr.mxu0 %v102_v37 }
  0x40   :  { %156 = vmatpush2.msra.mxu0 %v101_v38 }
  0x41   :  { %157 = vmatprep.subr.mxu0 %v100_v39 }
  0x42   :  { %158 = vmatpush2.msra.mxu0 %v99_v40 }
  0x43   :  { %159 = vmatprep.subr.mxu0 %v98_v41 }
  0x44   :  { %160 = vmatpush2.msra.mxu0 %v97_v42 }
  0x45   :  { %161 = vmatprep.subr.mxu0 %v96_v43 }
  0x46   :  { %162 = vmatpush2.msra.mxu0 %v95_v44 }
  0x47   :  { %163 = vmatprep.subr.mxu0 %v94_v45 }
  0x48   :  { %164 = vmatpush2.msra.mxu0 %v93_v46 }
  0x49   :  { %165 = vmatprep.subr.mxu0 %v92_v47 }
  0x4a   :  { %166 = vmatpush2.msra.mxu0 %v91_v48 }
  0x4b   :  { %167 = vmatprep.subr.mxu0 %v90_v49 }
  0x4c   :  { %168 = vmatpush2.msra.mxu0 %v89_v50 }
  0x4d   :  { %169 = vmatprep.subr.mxu0 %v88_v51 }
  0x4e   :  { %170 = vmatpush2.msra.mxu0 %v87_v52 }
  0x4f   :  { %171 = vmatprep.subr.mxu0 %v86_v53 }
  0x50   :  { %172 = vmatpush2.msra.mxu0 %v85_v54 }
  0x51   :  { %173 = vmatprep.subr.mxu0 %v84_v55 }
  0x52   :  { %174 = vmatpush2.msra.mxu0 %v83_v56 }
  0x53   :  { %175 = vmatprep.subr.mxu0 %v82_v57 }
  0x54   :  { %176 = vmatpush2.msra.mxu0 %v81_v58 }
  0x55   :  { %177 = vmatprep.subr.mxu0 %v80_v59 }
  0x56   :  { %178 = vmatpush2.msra.mxu0 %v79_v60 }
  0x57   :  { %179 = vmatprep.subr.mxu0 %v78_v61 }
  0x58   :  { %180 = vmatpush2.msra.mxu0 %v77_v62 }
  0x59   :  { %181 = vmatprep.subr.mxu0 %v76_v63 }
  0x5a   :  { %182 = vmatpush2.msra.mxu0 %v75_v0 }
  0x5b   :  { %184 = vmatmul.mubr.f32.vlgmr.msra.gmra.mxu0 %v41_v1 }
 0x11b   :  { %v185_v9 = vpop.f32.mrf.mxu0 }
 0x11c   :  { %v186_v10 = vadd.f32 %v185_v9, %v112_v7 }
 0x11d   :  { %v187_v11 = vpop.f32.mrf.mxu0 }
 0x11e   :  { %v190_v12 = vmax.f32 %v186_v10, 0.0  ;;  %v188_v13 = vadd.f32 %v187_v11, %v116_v8 }
 0x120   :  { %192 = vst [vmem:[#allocation7] sm:$0xff] %v190_v12  ;;  %v191_v14 = vmax.f32 %v188_v13, 0.0 }
 0x122   :  { %193 = vst [vmem:[#allocation7 + $0x8] sm:$0xff] %v191_v14 }
 0x123   :  { %266 = shalt.err (!%p263_p0)
}
 0x124   :  { %203 = dma.vmem_to_hbm [thread:$0]  %s201_s25, 256, %s321_s3, [#allocation4]  }
 0x125   :  { %279 = dma.done.wait [#allocation4], 256  }
 0x126   :  { %280 = vsyncadd [#allocation4], 4294967040 }
 0x127   :  { %207 = vsyncpa [#allocation3], 1 }
 0x128   :  { %208 = vsyncpa [#allocation6], 1 }
 0x129   :  { %209 = vsyncpa [#allocation4], 1 }

</bundles_post_ra>
